<compile_context>
chip_gen: v6e
topology: v6e:2x2x1
jax: 0.10.0
libtpu: 0.0.40
codegen_flags: <defaults>
</compile_context>

<pallas_src>
import math

import jax
import jax.numpy as jnp
from jax import lax
from jax.experimental import pallas as pl
from jax.experimental.pallas import tpu as pltpu


# ---------------------------------------------------------------------------
# 1) generic tiled linear kernel: y = x2d @ W_T + b      (x2d: (M, Din))
#    - weights pre-cast to bf16, x cast in-kernel, f32 accumulation
#    - Dout padded to a multiple of 128 for lane-dense (unmasked) stores
# ---------------------------------------------------------------------------
def linear_pallas(x2d, w_t, b, *, tile_m=512):
    M, Din = x2d.shape
    Dout = w_t.shape[1]

    Dout_p = ((Dout + 127) // 128) * 128
    if Dout_p != Dout:
        w_t = jnp.pad(w_t, ((0, 0), (0, Dout_p - Dout)))
        b = jnp.pad(b, (0, Dout_p - Dout))
    w_bf = w_t.astype(jnp.bfloat16)          # half the weight HBM traffic, bf16 MXU
    b2 = b.reshape(1, Dout_p)

    assert tile_m % 8 == 0, "tile_m must be a multiple of 8 (sublane granularity)"
    tm = M if M <= tile_m else tile_m
    grid_m = pl.cdiv(M, tm)

    def kernel(x_ref, w_ref, b_ref, o_ref):
        acc = lax.dot_general(x_ref[...].astype(jnp.bfloat16), w_ref[...],
                              (((1,), (0,)), ((), ())),
                              preferred_element_type=jnp.float32)
        o_ref[...] = acc + b_ref[...]

    y = pl.pallas_call(
        kernel,
        out_shape=jax.ShapeDtypeStruct((M, Dout_p), jnp.float32),
        grid=(grid_m,),
        in_specs=[
            pl.BlockSpec((tm, Din), lambda i: (i, 0)),
            pl.BlockSpec((Din, Dout_p), lambda i: (0, 0)),   # invariant -> DMA'd once
            pl.BlockSpec((1, Dout_p), lambda i: (0, 0)),
        ],
        out_specs=pl.BlockSpec((tm, Dout_p), lambda i: (i, 0)),
        compiler_params=pltpu.CompilerParams(
            dimension_semantics=("parallel",),
            vmem_limit_bytes=32 * 1024 * 1024),
    )(x2d, w_bf, b2)
    return y[:, :Dout] if Dout_p != Dout else y


# ---------------------------------------------------------------------------
# 2) fused betweenness + RoPE + attention, per batch row, all heads in-kernel
#    qkv layout per row: [ q (head-major even|odd) | k (same) | v | content ]
# ---------------------------------------------------------------------------
def fused_attn_pallas(qkv, packed, *, heads, dim_head, max_seq_len):
    B, S, four_inner = qkv.shape
    inner = heads * dim_head
    assert four_inner == 4 * inner
    Dh, Dh2 = dim_head, dim_head // 2
    HD2 = heads * Dh2
    scale = 1.0 / math.sqrt(dim_head)
    inv_sm2 = 1.0 / float(S - 2)
    max_pos = float(max_seq_len - 1)

    def kernel(qkv_ref, pk_ref, o_ref):
        bf_row = pk_ref[0:1, :]          # (1, HD2) head-tiled base freqs
        cbf = pk_ref[1:2, :]             # cos(base_freqs)
        sbf = pk_ref[2:3, :]             # sin(base_freqs)
        coef = pk_ref[3:4, :]            # gate * adjustment_scale (broadcast row)

        q_all = qkv_ref[0, :, 0:inner]                    # (S, inner) [even | odd]
        k_all = qkv_ref[0, :, inner:2 * inner]            # (S, inner) [even | odd]
        content = qkv_ref[0, :, 3 * inner:4 * inner]      # (S, inner) head-contiguous

        # ---- betweenness, all heads at once (neighbor-only distances, O(S*inner)) ----
        c_next = pltpu.roll(content, shift=S - 1, axis=0)     # content[j+1]
        c_prev = pltpu.roll(content, shift=1, axis=0)         # content[j-1]
        e_next = content - c_next
        e_next = e_next * e_next
        e_dir = c_prev - c_next
        e_dir = e_dir * e_dir
        # per-head group sum of squared diffs via a tiny 0/1 matmul (lanes -> heads)
        g_row = lax.broadcasted_iota(jnp.int32, (inner, heads), 0) // Dh
        g_col = lax.broadcasted_iota(jnp.int32, (inner, heads), 1)
        G = (g_row == g_col).astype(jnp.float32)               # (inner, H)
        dn = (((1,), (0,)), ((), ()))
        d1 = jnp.sqrt(lax.dot_general(e_next, G, dn,
                                      preferred_element_type=jnp.float32))   # dist(j, j+1)
        direct = jnp.sqrt(lax.dot_general(e_dir, G, dn,
                                          preferred_element_type=jnp.float32))  # dist(j-1, j+1)
        d1p = pltpu.roll(d1, shift=1, axis=0)                  # dist(j-1, j)
        path = d1p + d1
        score = jnp.maximum(1.0 - (path - direct) / jnp.maximum(direct, 1e-6), 0.0)
        pos_idx = lax.broadcasted_iota(jnp.int32, (S, 1), 0)
        valid = jnp.logical_and(pos_idx >= 1, pos_idx <= S - 2).astype(jnp.float32)
        betw = valid * score * inv_sm2                          # (S, H), wraparound masked

        # ---- betweenness-adjusted interpolated RoPE, batched over heads ----
        # expand (S, H) -> (S, H*Dh2) with a 0/1 block-repeat matmul
        e_row = lax.broadcasted_iota(jnp.int32, (heads, HD2), 0)
        e_col = lax.broadcasted_iota(jnp.int32, (heads, HD2), 1) // Dh2
        E = (e_row == e_col).astype(jnp.float32)                # (H, H*Dh2)
        betw_w = lax.dot_general(betw, E, dn, preferred_element_type=jnp.float32)
        pos_f = lax.broadcasted_iota(jnp.int32, (S, HD2), 0).astype(jnp.float32)
        pos = jnp.clip(pos_f + (betw_w - 0.5) * coef, 0.0, max_pos)
        lo = jnp.floor(pos)
        frac = pos - lo                                         # (S, HD2)
        theta = lo * bf_row
        cos_lo = jnp.cos(theta)
        sin_lo = jnp.sin(theta)
        # angle addition: hi = lo + 1 (frac == 0 exactly when hi would equal lo)
        cos_hi = cos_lo * cbf - sin_lo * sbf
        sin_hi = sin_lo * cbf + cos_lo * sbf
        cos_i = cos_lo + frac * (cos_hi - cos_lo)
        sin_i = sin_lo + frac * (sin_hi - sin_lo)               # (S, HD2)

        qe, qo = q_all[:, 0:HD2], q_all[:, HD2:inner]
        ke, ko = k_all[:, 0:HD2], k_all[:, HD2:inner]
        # 1/sqrt(Dh) folded into q (moves the (S,S) scale down to (S,Dh2) ops)
        qe_r = ((qe * cos_i - qo * sin_i) * scale).astype(jnp.bfloat16)
        qo_r = ((qo * cos_i + qe * sin_i) * scale).astype(jnp.bfloat16)
        ke_r = (ke * cos_i - ko * sin_i).astype(jnp.bfloat16)
        ko_r = (ko * cos_i + ke * sin_i).astype(jnp.bfloat16)

        dnt = (((1,), (1,)), ((), ()))                          # contract last dims
        for h in range(heads):                                  # static unroll
            sl = slice(h * Dh2, (h + 1) * Dh2)
            scores = (lax.dot_general(qe_r[:, sl], ke_r[:, sl], dnt,
                                      preferred_element_type=jnp.float32)
                      + lax.dot_general(qo_r[:, sl], ko_r[:, sl], dnt,
                                        preferred_element_type=jnp.float32))   # (S, S)
            m = jnp.max(scores, axis=-1, keepdims=True)
            e = jnp.exp(scores - m)
            s = jnp.sum(e, axis=-1, keepdims=True)
            v_h = qkv_ref[0, :, 2 * inner + h * Dh:2 * inner + (h + 1) * Dh]
            o_h = lax.dot_general(e.astype(jnp.bfloat16), v_h.astype(jnp.bfloat16),
                                  dn, preferred_element_type=jnp.float32)
            # deferred normalization: EUP reciprocal on an (S,1), not an (S,S) divide
            o_ref[0, :, h * Dh:(h + 1) * Dh] = o_h * pl.reciprocal(s, approx=True)

    return pl.pallas_call(
        kernel,
        out_shape=jax.ShapeDtypeStruct((B, S, inner), jnp.float32),
        grid=(B,),
        in_specs=[
            pl.BlockSpec((1, S, four_inner), lambda b: (b, 0, 0)),
            pl.BlockSpec((4, HD2), lambda b: (0, 0)),
        ],
        out_specs=pl.BlockSpec((1, S, inner), lambda b: (b, 0, 0)),
        compiler_params=pltpu.CompilerParams(
            dimension_semantics=("parallel",),
            vmem_limit_bytes=32 * 1024 * 1024),
    )(qkv, packed)


# ---------------------------------------------------------------------------
# Full forward (trace-level glue only; hot paths live in the two kernels above)
# ---------------------------------------------------------------------------
def betweenness_attention(x, p, *, heads, dim_head, max_seq_len, adj_scale):
    B, S, Din = x.shape
    assert S > 2, "betweenness path assumes seq_len > 2 (as in the reference loop)"
    inner = heads * dim_head
    Dh, Dh2 = dim_head, dim_head // 2

    # q/k projection rows permuted to head-major [all-even | all-odd]; q.k per head
    # is invariant under this consistent permutation and v is untouched.
    even = jnp.arange(0, Dh, 2)
    odd = jnp.arange(1, Dh, 2)
    head_off = jnp.arange(heads)[:, None] * Dh
    perm = jnp.concatenate([(head_off + even[None, :]).reshape(-1),
                            (head_off + odd[None, :]).reshape(-1)])         # (inner,)

    Wq_p, bq_p = p["Wq"][perm], p["bq"][perm]
    Wk_p, bk_p = p["Wk"][perm], p["bk"][perm]

    # fold content projection into the QKV linear:
    #   content_h = x @ (Wc @ Wq_h)^T + (Wc @ bq_h + bc)
    Wq_h = p["Wq"].reshape(heads, Dh, Din)
    Wcq = jnp.einsum("ef,hfd->hed", p["Wc"], Wq_h,
                     precision=lax.Precision.HIGHEST).reshape(inner, Din)
    bcq = (jnp.einsum("ef,hf->he", p["Wc"], p["bq"].reshape(heads, Dh),
                      precision=lax.Precision.HIGHEST)
           + p["bc"][None, :]).reshape(inner)

    Wfused_T = jnp.concatenate([Wq_p, Wk_p, p["Wv"], Wcq], axis=0).T        # (Din, 4*inner)
    bfused = jnp.concatenate([bq_p, bk_p, p["bv"], bcq])                    # (4*inner,)

    # one packed small operand: [base_freqs | cos | sin | gate*adj_scale], head-tiled
    bf_t = jnp.tile(p["base_freqs"], heads)                                 # (H*Dh2,)
    coef = jnp.broadcast_to(p["gate"][0] * adj_scale, bf_t.shape)
    packed = jnp.stack([bf_t, jnp.cos(bf_t), jnp.sin(bf_t), coef], axis=0)  # (4, H*Dh2)

    # fused QKV + content projection: one HBM pass over x
    qkv = linear_pallas(x.reshape(B * S, Din), Wfused_T, bfused).reshape(B, S, 4 * inner)

    attn = fused_attn_pallas(qkv, packed, heads=heads, dim_head=dim_head,
                             max_seq_len=max_seq_len)                       # (B, S, inner)

    out = linear_pallas(attn.reshape(B * S, inner), p["Wo"].T, p["bo"])
    return out.reshape(B, S, Din)


# ---------------------------------------------------------------------------
# Pure-JAX reference (mirrors the PyTorch forward) for a sanity check
# ---------------------------------------------------------------------------
def reference_forward(x, p, *, heads, dim_head, max_seq_len, adj_scale):
    B, S, _ = x.shape
    lin = lambda t, W, b: t @ W.T + b
    q = lin(x, p["Wq"], p["bq"]).reshape(B, S, heads, dim_head)
    k = lin(x, p["Wk"], p["bk"]).reshape(B, S, heads, dim_head)
    v = lin(x, p["Wv"], p["bv"]).reshape(B, S, heads, dim_head)

    qf = jnp.transpose(q, (0, 2, 1, 3)).reshape(B * heads, S, dim_head)
    content = qf @ p["Wc"].T + p["bc"]
    diff = content[:, :, None, :] - content[:, None, :, :]
    dist = jnp.sqrt(jnp.sum(diff * diff, axis=-1))
    i = jnp.arange(S - 2)
    direct = dist[:, i, i + 2]
    path = dist[:, i, i + 1] + dist[:, i + 1, i + 2]
    score = jnp.maximum(1.0 - (path - direct) / jnp.maximum(direct, 1e-6), 0.0)
    betw = jnp.zeros((B * heads, S)).at[:, 1:S - 1].set(score / (S - 2))
    betw = betw.reshape(B, heads, S).transpose(0, 2, 1)        # (B, S, H)

    bf = p["base_freqs"]
    gate = p["gate"][0]

    def rope(t):
        adj = gate * (betw - 0.5) * adj_scale                  # (B, S, H)
        pos = jnp.clip(jnp.arange(S, dtype=jnp.float32)[None, :, None] + adj,
                       0.0, float(max_seq_len - 1))
        lo = jnp.floor(pos); hi = jnp.ceil(pos)
        frac = (pos - lo)[..., None]
        cos_i = (1 - frac) * jnp.cos(lo[..., None] * bf) + frac * jnp.cos(hi[..., None] * bf)
        sin_i = (1 - frac) * jnp.sin(lo[..., None] * bf) + frac * jnp.sin(hi[..., None] * bf)
        te, to = t[..., 0::2], t[..., 1::2]
        oe = te * cos_i - to * sin_i
        oo = to * cos_i + te * sin_i
        return jnp.stack([oe, oo], axis=-1).reshape(t.shape)

    qr = jnp.transpose(rope(q), (0, 2, 1, 3))
    kr = jnp.transpose(rope(k), (0, 2, 1, 3))
    vt = jnp.transpose(v, (0, 2, 1, 3))
    sc = jnp.einsum("bhqd,bhkd->bhqk", qr, kr) / math.sqrt(dim_head)
    w = jax.nn.softmax(sc, axis=-1)
    o = jnp.einsum("bhqk,bhkd->bhqd", w, vt)
    o = jnp.transpose(o, (0, 2, 1, 3)).reshape(B, S, heads * dim_head)
    return lin(o, p["Wo"], p["bo"])


# ---------------------------------------------------------------------------
if __name__ == "__main__":
    # small config consistent with the module
    B, S, DIM = 2, 8, 32
    HEADS, DIM_HEAD = 2, 16
    INNER = HEADS * DIM_HEAD
    MAX_SEQ_LEN = 64
    ADJ_SCALE = 0.1

    key = jax.random.PRNGKey(0)
    ks = jax.random.split(key, 12)

    def init_linear(kw, kb, dout, din):
        lim = 1.0 / math.sqrt(din)
        W = jax.random.uniform(kw, (dout, din), jnp.float32, -lim, lim)
        b = jax.random.uniform(kb, (dout,), jnp.float32, -lim, lim)
        return W, b

    Wq, bq = init_linear(ks[0], ks[1], INNER, DIM)
    Wk, bk = init_linear(ks[2], ks[3], INNER, DIM)
    Wv, bv = init_linear(ks[4], ks[5], INNER, DIM)
    Wo, bo = init_linear(ks[6], ks[7], DIM, INNER)
    Wc, bc = init_linear(ks[8], ks[9], DIM_HEAD, DIM_HEAD)

    params = dict(
        Wq=Wq, bq=bq, Wk=Wk, bk=bk, Wv=Wv, bv=bv, Wo=Wo, bo=bo, Wc=Wc, bc=bc,
        gate=jnp.array([0.5], dtype=jnp.float32),
        base_freqs=(1.0 / 10000.0 ** (jnp.arange(0, DIM_HEAD, 2, dtype=jnp.float32)
                                      / DIM_HEAD)),
    )

    x = jax.random.normal(ks[10], (B, S, DIM), dtype=jnp.float32)

    out = betweenness_attention(x, params, heads=HEADS, dim_head=DIM_HEAD,
                                max_seq_len=MAX_SEQ_LEN, adj_scale=ADJ_SCALE)
    out = jax.block_until_ready(out)

    assert out.shape == (B, S, DIM), out.shape
    assert bool(jnp.all(jnp.isfinite(out)))

    with jax.default_matmul_precision("float32"):
        ref = reference_forward(x, params, heads=HEADS, dim_head=DIM_HEAD,
                                max_seq_len=MAX_SEQ_LEN, adj_scale=ADJ_SCALE)
    ref = jax.block_until_ready(ref)
    assert bool(jnp.allclose(out, ref, rtol=2e-2, atol=2e-2)), \
        float(jnp.max(jnp.abs(out - ref)))

    print("KERNEL_OK")
</pallas_src>

<mosaic_0001>
module attributes {stable_mosaic.version = 11 : i64} {
  func.func @kernel(%arg0: i32, %arg1: memref<16x32xf32, #tpu.memory_space<vmem>>, %arg2: memref<32x128xbf16, #tpu.memory_space<vmem>>, %arg3: memref<1x128xf32, #tpu.memory_space<vmem>>, %arg4: memref<16x128xf32, #tpu.memory_space<vmem>>) attributes {dimension_semantics = [#tpu.dimension_semantics<parallel>], iteration_bounds = array<i64: 1>, scalar_prefetch = 0 : i64, scratch_operands = 0 : i64, tpu.core_type = #tpu.core_type<tc>, window_params = [{transform_indices = @transform_0, window_bounds = array<i64: 16, 32>}, {pipeline_mode = #tpu.pipeline_mode<synchronous>, transform_indices = @transform_1, window_bounds = array<i64: 32, 128>}, {pipeline_mode = #tpu.pipeline_mode<synchronous>, transform_indices = @transform_2, window_bounds = array<i64: 1, 128>}, {transform_indices = @transform_3, window_bounds = array<i64: 16, 128>}]} {
    %c0 = arith.constant 0 : index
    %c0_0 = arith.constant 0 : index
    %0 = vector.load %arg1[%c0, %c0_0] : memref<16x32xf32, #tpu.memory_space<vmem>>, vector<16x32xf32>
    %1 = arith.truncf %0 : vector<16x32xf32> to vector<16x32xbf16>
    %c0_1 = arith.constant 0 : index
    %c0_2 = arith.constant 0 : index
    %2 = vector.load %arg2[%c0_1, %c0_2] : memref<32x128xbf16, #tpu.memory_space<vmem>>, vector<32x128xbf16>
    %cst = arith.constant dense<0.000000e+00> : vector<16x128xf32>
    %3 = tpu.matmul %1, %2, %cst {dimension_numbers = #tpu.dot_dimension_numbers<[1], [0], [0], [1], [0, 0, 1, 1], [], []>} : vector<16x32xbf16>, vector<32x128xbf16>, vector<16x128xf32> -> vector<16x128xf32>
    %c0_3 = arith.constant 0 : index
    %c0_4 = arith.constant 0 : index
    %4 = vector.load %arg3[%c0_3, %c0_4] : memref<1x128xf32, #tpu.memory_space<vmem>>, vector<1x128xf32>
    %5 = vector.broadcast %4 : vector<1x128xf32> to vector<16x128xf32>
    %6 = arith.addf %3, %5 : vector<16x128xf32>
    %c0_5 = arith.constant 0 : index
    %c0_6 = arith.constant 0 : index
    %7 = vector.load %arg4[%c0_5, %c0_6] : memref<16x128xf32, #tpu.memory_space<vmem>>, vector<16x128xf32>
    tpu.vector_store %arg4[%c0_5, %c0_6], %6 {strides = array<i32>} : memref<16x128xf32, #tpu.memory_space<vmem>>, vector<16x128xf32>,
    return
  }
  func.func @transform_0(%arg0: i32) -> (i32, i32) {
    %c0_i32 = arith.constant 0 : i32
    %c0_i32_0 = arith.constant 0 : i32
    return %arg0, %c0_i32 : i32, i32
  }
  func.func @transform_1(%arg0: i32) -> (i32, i32) {
    %c0_i32 = arith.constant 0 : i32
    %c0_i32_0 = arith.constant 0 : i32
    %c0_i32_1 = arith.constant 0 : i32
    return %c0_i32, %c0_i32_0 : i32, i32
  }
  func.func @transform_2(%arg0: i32) -> (i32, i32) {
    %c0_i32 = arith.constant 0 : i32
    %c0_i32_0 = arith.constant 0 : i32
    %c0_i32_1 = arith.constant 0 : i32
    return %c0_i32, %c0_i32_0 : i32, i32
  }
  func.func @transform_3(%arg0: i32) -> (i32, i32) {
    %c0_i32 = arith.constant 0 : i32
    %c0_i32_0 = arith.constant 0 : i32
    return %arg0, %c0_i32 : i32, i32
  }
}

</mosaic_0001>

<bundles_post_ra>
// kernel: tpu_custom_call.1
= control target key start
LH: loop header
LB: loop body
LE: loop exit
PB: predicated region body
PF: predicated region fallthrough
CT: control target
= control target key end

     0   :  { %8 = vsyncpa [#allocation3], 0  ;;  %s274_s0 = inlined_call_operand.hbm [shape: f32[16,32], index: 0, kind: input, shape index: {}]   ;;  %s275_s1 = inlined_call_operand.hbm [shape: bf16[32,128], index: 1, kind: input, shape index: {}]   ;;  %s276_s2 = inlined_call_operand.vmem [shape: f32[1,128], index: 2, kind: input, shape index: {}]   ;;  %s277_s3 = inlined_call_operand.hbm [shape: f32[16,128], index: 3, kind: output, shape index: {}]  }
   0x1   :  { %9 = vsyncpa [#allocation6], 0 }
   0x2   :  { %10 = vsyncpa [#allocation4], 0  ;;  %s227_s12 = smov [#allocation2]  }
   0x3   :  { %s16_s13 = sshll.u32 %s227_s12, 4  ;;  %s17_s13 = int_to_ptr.vmem [resolvable:$true] %s16_s13 }
   0x4   :  { %s169_s14 = scalar_lea.vmem %s17_s13, 256  ;;  %p174_p1 = scmp.lt.s32.totalorder %s17_s13, %s17_s13 }
   0x5   :  { %p170_p0 = scmp.ne.s32.totalorder %s17_s13, %s169_s14  ;;  %p175_p2 = scmp.lt.s32.totalorder %s169_s14, %s169_s14 }
   0x7   :  { %p176_p3 = por %p175_p2, %p174_p1 }
   0x9   :  { %p177_p4 = pnand %p176_p3, %p170_p0 }
   0xb   :  { %180 = shalt.err (!%p177_p4)
}
   0xc   :  { %s228_s15 = smov 128   ;;  %s229_s16 = smov 8  }
   0xd   :  { %22 = dma.hbm_to_vmem [thread:$0]  %s274_s0, 256, %s17_s13, [#allocation3], %s228_s15, %s228_s15, %s229_s16  }
   0xe   :  { %s230_s19 = smov [#allocation5]  }
   0xf   :  { %s28_s20 = sshll.u32 %s230_s19, 4  ;;  %s29_s20 = int_to_ptr.vmem [resolvable:$true] %s28_s20 }
  0x10   :  { %s189_s21 = scalar_lea.vmem %s29_s20, 256  ;;  %p194_p6 = scmp.lt.s32.totalorder %s29_s20, %s29_s20 }
  0x11   :  { %p190_p5 = scmp.ne.s32.totalorder %s29_s20, %s189_s21  ;;  %p195_p7 = scmp.lt.s32.totalorder %s189_s21, %s189_s21 }
  0x13   :  { %p196_p8 = por %p195_p7, %p194_p6 }
  0x15   :  { %p197_p9 = pnand %p196_p8, %p190_p5 }
  0x17   :  { %200 = shalt.err (!%p197_p9)
}
  0x18   :  { %s231_s22 = smov 64   ;;  %s232_s23 = smov 4  }
  0x19   :  { %34 = dma.hbm_to_vmem [thread:$0]  %s275_s1, 256, %s29_s20, [#allocation6], %s231_s22, %s231_s22, %s232_s23  }
  0x1a   :  { %221 = dma.done.wait [#allocation3], 256  }
  0x1b   :  { %222 = vsyncadd [#allocation3], 4294967040 }
  0x1c   :  { %223 = dma.done.wait [#allocation6], 256  }
  0x1d   :  { %224 = vsyncadd [#allocation6], 4294967040  ;;  %v233_v0 = vmov 0.0   ;;  %vm234_vm0 = vmmov 0   ;;  %v159_v1 = vld [vmem:[#allocation5 + $0x8] sm:$0xff]   ;;  %v160_v2 = vld [vmem:[#allocation5] sm:$0xff]  }
  0x1e   :  { %142 = vmatprep.subr.bf16.mxu0 %v233_v0  ;;  %146 = vmatprep.mubr.msk.bf16.mxu0 %vm234_vm0, %v233_v0  ;;  %v44_v3 = vld [vmem:[#allocation2] sm:$0xff]  ;;  %v45_v4 = vld [vmem:[#allocation2 + $0x8] sm:$0xff]  ;;  %vm70_vm1 = vcmask 261120   ;;  %s235_s26 = smov [#allocation7]  }
  0x1f   :  { %143 = vmatpush3.bf16.msra.mxu0 %v159_v1  ;;  %v46_v5 = vpack.c.bf16 %v45_v4, %v44_v3  ;;  %v135_v6 = vld [vmem:[%s276_s2] ss:$0 sm:$0xff]  ;;  %s122_s27 = sshll.u32 %s235_s26, 4  ;;  %s123_s27 = int_to_ptr.vmem [resolvable:$true] %s122_s27 }
  0x20   :  { %144 = vmatprep.subr.bf16.mxu0 %v233_v0  ;;  %s201_s28 = scalar_lea.vmem %s123_s27, 256  ;;  %p206_p11 = scmp.lt.s32.totalorder %s123_s27, %s123_s27 }
  0x21   :  { %p202_p10 = scmp.ne.s32.totalorder %s123_s27, %s201_s28  ;;  %p207_p12 = scmp.lt.s32.totalorder %s201_s28, %s201_s28 }
  0x23   :  { %145 = vmatpush3.bf16.msra.mxu0 %v160_v2  ;;  %p208_p13 = por %p207_p12, %p206_p11 }
  0x25   :  { %p209_p0 = pnand %p208_p13, %p202_p10 }
  0x26   :  { %147 = vmatmul.mubr.msk.bf16.vlgmr.msra.gmra.mxu0 %vm70_vm1, %v46_v5 }
  0xe6   :  { %v108_v7 = vpop.f32.mrf.mxu0 }
  0xe7   :  { %v109_v8 = vadd.f32 %v135_v6, %v108_v7 }
  0xe8   :  { %v148_v9 = vpop.f32.mrf.mxu0 }
  0xe9   :  { %115 = vst [vmem:[#allocation7] sm:$0xff] %v109_v8 }
  0xea   :  { %v111_v10 = vpop.f32.mrf.mxu0 }
  0xeb   :  { %v112_v11 = vadd.f32 %v135_v6, %v111_v10 }
  0xec   :  { %v149_v12 = vpop.f32.mrf.mxu0 }
  0xed   :  { %116 = vst [vmem:[#allocation7 + $0x8] sm:$0xff] %v112_v11 }
  0xee   :  { %212 = shalt.err (!%p209_p0)
}
  0xef   :  { %128 = dma.vmem_to_hbm [thread:$0]  %s123_s27, 256, %s277_s3, [#allocation4], %s228_s15, %s228_s15, %s229_s16  }
  0xf0   :  { %225 = dma.done.wait [#allocation4], 256  }
  0xf1   :  { %226 = vsyncadd [#allocation4], 4294967040 }
  0xf2   :  { %132 = vsyncpa [#allocation3], 1 }
  0xf3   :  { %133 = vsyncpa [#allocation6], 1 }
  0xf4   :  { %134 = vsyncpa [#allocation4], 1 }

</bundles_post_ra>
